<compile_context>
chip_gen: v6e
topology: v6e:2x2x1
jax: 0.10.0
libtpu: 0.0.40
codegen_flags: <defaults>
</compile_context>

<pallas_src>
import functools

import jax
import jax.numpy as jnp
from jax.experimental import pallas as pl
from jax.experimental.pallas import tpu as pltpu


def _round_up(n: int, m: int) -> int:
    return (n + m - 1) // m * m


def _vae_kernel(
    x_ref, eps_ref,
    w1_ref, b1_ref,       # encoder layer 1:        (Dpad, H),    (1, H)
    w2_ref, b2_ref,       # fused mu|log_var head:  (H, 2*Lpad),  (1, 2*Lpad)
    w3_ref, b3_ref,       # decoder layer 1:        (Lpad, H),    (1, H)
    w4_ref, b4_ref,       # decoder layer 2:        (H, Dpad),    (1, Dpad)
    recon_ref, mulv_ref,
    *, lpad: int,
):
    x = x_ref[...]              # (TB, Dpad) in matmul dtype (bf16 or f32)
    mm_dtype = x.dtype

    # ---- encoder layer 1 + ReLU (f32 accumulate / f32 elementwise) ----
    h1 = jnp.dot(x, w1_ref[...], preferred_element_type=jnp.float32) + b1_ref[...]
    h1 = jnp.maximum(h1, 0.0)

    # ---- fused encoder head: one matmul, split at a lane-tile boundary ----
    enc = jnp.dot(h1.astype(mm_dtype), w2_ref[...],
                  preferred_element_type=jnp.float32) + b2_ref[...]
    mu = enc[:, :lpad]          # lanes [0, Lpad)
    log_var = enc[:, lpad:]     # lanes [Lpad, 2*Lpad)

    # ---- reparameterize (f32): z = mu + eps * exp(0.5 * log_var) ----
    z = mu + eps_ref[...] * jnp.exp(0.5 * log_var)

    # ---- decoder ----
    h2 = jnp.dot(z.astype(mm_dtype), w3_ref[...],
                 preferred_element_type=jnp.float32) + b3_ref[...]
    h2 = jnp.maximum(h2, 0.0)
    logits = jnp.dot(h2.astype(mm_dtype), w4_ref[...],
                     preferred_element_type=jnp.float32) + b4_ref[...]

    recon_ref[...] = jax.nn.sigmoid(logits)     # (TB, Dpad) f32, lane-dense
    mulv_ref[...] = enc                         # (TB, 2*Lpad) f32, lane-dense


def init_params(key, input_dim, latent_dim, hidden=128):
    """PyTorch-style Linear init; weights stored pre-transposed as (in, out)."""
    keys = jax.random.split(key, 8)

    def linear(kw, kb, fan_in, fan_out):
        bound = 1.0 / jnp.sqrt(fan_in)
        w = jax.random.uniform(kw, (fan_in, fan_out), jnp.float32, -bound, bound)
        b = jax.random.uniform(kb, (1, fan_out), jnp.float32, -bound, bound)
        return w, b

    w1, b1 = linear(keys[0], keys[1], input_dim, hidden)          # Linear(D, 128)
    w2, b2 = linear(keys[2], keys[3], hidden, 2 * latent_dim)     # Linear(128, 2L)
    w2mu, w2lv = w2[:, :latent_dim], w2[:, latent_dim:]
    b2mu, b2lv = b2[:, :latent_dim], b2[:, latent_dim:]
    w3, b3 = linear(keys[4], keys[5], latent_dim, hidden)         # Linear(L, 128)
    w4, b4 = linear(keys[6], keys[7], hidden, input_dim)          # Linear(128, D)

    return dict(w1=w1, b1=b1, w2mu=w2mu, b2mu=b2mu, w2lv=w2lv, b2lv=b2lv,
                w3=w3, b3=b3, w4=w4, b4=b4)


def pack_params(params, input_dim, latent_dim, hidden=128, use_bf16=True):
    """Pad weights/biases to lane-dense shapes, fuse the mu/log_var head and
    cast matmul operands to bf16 (biases stay f32; elementwise math stays f32)."""
    D, L, H = input_dim, latent_dim, hidden
    Dpad, Lpad = _round_up(D, 128), _round_up(L, 128)
    mm_dtype = jnp.bfloat16 if use_bf16 else jnp.float32

    def pad_to(a, shape):
        out = jnp.zeros(shape, jnp.float32)
        return out.at[tuple(slice(0, s) for s in a.shape)].set(a)

    w1 = pad_to(params["w1"], (Dpad, H)).astype(mm_dtype)
    b1 = pad_to(params["b1"], (1, H))

    # Fused head: columns [0:L] -> mu, [Lpad:Lpad+L] -> log_var, rest zero.
    w2 = jnp.zeros((H, 2 * Lpad), jnp.float32)
    w2 = w2.at[:, :L].set(params["w2mu"]).at[:, Lpad:Lpad + L].set(params["w2lv"])
    b2 = jnp.zeros((1, 2 * Lpad), jnp.float32)
    b2 = b2.at[:, :L].set(params["b2mu"]).at[:, Lpad:Lpad + L].set(params["b2lv"])
    w2 = w2.astype(mm_dtype)

    w3 = pad_to(params["w3"], (Lpad, H)).astype(mm_dtype)
    b3 = pad_to(params["b3"], (1, H))
    w4 = pad_to(params["w4"], (H, Dpad)).astype(mm_dtype)
    b4 = pad_to(params["b4"], (1, Dpad))

    return dict(w1=w1, b1=b1, w2=w2, b2=b2, w3=w3, b3=b3, w4=w4, b4=b4)


def vae_forward(x, eps, kparams):
    """VAE forward as one Pallas kernel over a padded batch grid.

    x: (B, D) f32, eps: (B, L) f32, kparams: output of pack_params.
    Returns (recon (B, D), mu (B, L), log_var (B, L)) in f32.
    """
    B, D = x.shape
    L = eps.shape[1]
    Dpad, H = kparams["w1"].shape
    Lpad = kparams["w3"].shape[0]
    mm_dtype = kparams["w1"].dtype

    # Batch tile: up to 256 rows per grid step (fills the MXU row dim on v6e/v7x);
    # tiny batches just round up to a multiple of 8 sublanes.
    TB = min(256, _round_up(B, 8))
    B_pad = _round_up(B, TB)

    x_pad = jnp.zeros((B_pad, Dpad), jnp.float32).at[:B, :D].set(x).astype(mm_dtype)
    eps_pad = jnp.zeros((B_pad, Lpad), jnp.float32).at[:B, :L].set(eps)

    grid = (B_pad // TB,)

    def batch_spec(cols):
        return pl.BlockSpec((TB, cols), lambda i: (i, 0))

    def resident_spec(shape):
        return pl.BlockSpec(shape, lambda i: (0, 0))

    in_specs = [
        batch_spec(Dpad),                       # x
        batch_spec(Lpad),                       # eps
        resident_spec(kparams["w1"].shape), resident_spec(kparams["b1"].shape),
        resident_spec(kparams["w2"].shape), resident_spec(kparams["b2"].shape),
        resident_spec(kparams["w3"].shape), resident_spec(kparams["b3"].shape),
        resident_spec(kparams["w4"].shape), resident_spec(kparams["b4"].shape),
    ]
    out_specs = (batch_spec(Dpad), batch_spec(2 * Lpad))
    out_shape = (
        jax.ShapeDtypeStruct((B_pad, Dpad), jnp.float32),
        jax.ShapeDtypeStruct((B_pad, 2 * Lpad), jnp.float32),
    )

    itemsize = jnp.dtype(mm_dtype).itemsize
    weight_elems = Dpad * H + H * 2 * Lpad + Lpad * H + H * Dpad
    flops = 2 * B_pad * weight_elems
    transcendentals = B_pad * (Lpad + Dpad)                    # exp + sigmoid
    bytes_accessed = (
        B_pad * (Dpad * itemsize + Lpad * 4)                   # x, eps
        + weight_elems * itemsize                              # weights
        + (H + 2 * Lpad + H + Dpad) * 4                        # biases
        + B_pad * (Dpad + 2 * Lpad) * 4                        # outputs
    )

    recon_pad, mulv_pad = pl.pallas_call(
        functools.partial(_vae_kernel, lpad=Lpad),
        grid=grid,
        in_specs=in_specs,
        out_specs=out_specs,
        out_shape=out_shape,
        compiler_params=pltpu.CompilerParams(
            dimension_semantics=("parallel",),
        ),
        cost_estimate=pl.CostEstimate(
            flops=flops,
            transcendentals=transcendentals,
            bytes_accessed=bytes_accessed,
        ),
    )(x_pad, eps_pad,
      kparams["w1"], kparams["b1"], kparams["w2"], kparams["b2"],
      kparams["w3"], kparams["b3"], kparams["w4"], kparams["b4"])

    recon = recon_pad[:B, :D]
    mu = mulv_pad[:B, :L]
    log_var = mulv_pad[:B, Lpad:Lpad + L]
    return recon, mu, log_var


if __name__ == "__main__":
    key = jax.random.PRNGKey(0)
    k_x, k_eps, k_params = jax.random.split(key, 3)

    batch = 8
    input_dim = 32     # stands in for data_tensor.shape[1] from the csv
    latent_dim = 10
    hidden = 128

    x = jax.random.uniform(k_x, (batch, input_dim), jnp.float32)        # tabular rows
    eps = jax.random.normal(k_eps, (batch, latent_dim), jnp.float32)    # torch.randn_like(std)

    params = init_params(k_params, input_dim, latent_dim, hidden)
    kparams = pack_params(params, input_dim, latent_dim, hidden, use_bf16=True)

    recon, mu, log_var = jax.block_until_ready(jax.jit(vae_forward)(x, eps, kparams))

    # pure-JAX f32 reference (semantics check; kernel matmuls run in bf16 w/ f32 acc)
    h1 = jnp.maximum(x @ params["w1"] + params["b1"], 0.0)
    mu_ref = h1 @ params["w2mu"] + params["b2mu"]
    lv_ref = h1 @ params["w2lv"] + params["b2lv"]
    z_ref = mu_ref + eps * jnp.exp(0.5 * lv_ref)
    h2 = jnp.maximum(z_ref @ params["w3"] + params["b3"], 0.0)
    recon_ref = jax.nn.sigmoid(h2 @ params["w4"] + params["b4"])

    assert recon.shape == (batch, input_dim)
    assert mu.shape == (batch, latent_dim) and log_var.shape == (batch, latent_dim)
    assert jnp.allclose(recon, recon_ref, atol=3e-2, rtol=3e-2)
    assert jnp.allclose(mu, mu_ref, atol=3e-2, rtol=3e-2)
    assert jnp.allclose(log_var, lv_ref, atol=3e-2, rtol=3e-2)

    print("KERNEL_OK")
</pallas_src>

<mosaic_0001>
module attributes {stable_mosaic.version = 11 : i64} {
  func.func @_vae_kernel(%arg0: i32, %arg1: memref<8x128xbf16, #tpu.memory_space<vmem>>, %arg2: memref<8x128xf32, #tpu.memory_space<vmem>>, %arg3: memref<128x128xbf16, #tpu.memory_space<vmem>>, %arg4: memref<1x128xf32, #tpu.memory_space<vmem>>, %arg5: memref<128x256xbf16, #tpu.memory_space<vmem>>, %arg6: memref<1x256xf32, #tpu.memory_space<vmem>>, %arg7: memref<128x128xbf16, #tpu.memory_space<vmem>>, %arg8: memref<1x128xf32, #tpu.memory_space<vmem>>, %arg9: memref<128x128xbf16, #tpu.memory_space<vmem>>, %arg10: memref<1x128xf32, #tpu.memory_space<vmem>>, %arg11: memref<8x128xf32, #tpu.memory_space<vmem>>, %arg12: memref<8x256xf32, #tpu.memory_space<vmem>>) attributes {dimension_semantics = [#tpu.dimension_semantics<parallel>], iteration_bounds = array<i64: 1>, scalar_prefetch = 0 : i64, scratch_operands = 0 : i64, tpu.core_type = #tpu.core_type<tc>, window_params = [{transform_indices = @transform_0, window_bounds = array<i64: 8, 128>}, {transform_indices = @transform_1, window_bounds = array<i64: 8, 128>}, {pipeline_mode = #tpu.pipeline_mode<synchronous>, transform_indices = @transform_2, window_bounds = array<i64: 128, 128>}, {pipeline_mode = #tpu.pipeline_mode<synchronous>, transform_indices = @transform_3, window_bounds = array<i64: 1, 128>}, {pipeline_mode = #tpu.pipeline_mode<synchronous>, transform_indices = @transform_4, window_bounds = array<i64: 128, 256>}, {pipeline_mode = #tpu.pipeline_mode<synchronous>, transform_indices = @transform_5, window_bounds = array<i64: 1, 256>}, {pipeline_mode = #tpu.pipeline_mode<synchronous>, transform_indices = @transform_6, window_bounds = array<i64: 128, 128>}, {pipeline_mode = #tpu.pipeline_mode<synchronous>, transform_indices = @transform_7, window_bounds = array<i64: 1, 128>}, {pipeline_mode = #tpu.pipeline_mode<synchronous>, transform_indices = @transform_8, window_bounds = array<i64: 128, 128>}, {pipeline_mode = #tpu.pipeline_mode<synchronous>, transform_indices = @transform_9, window_bounds = array<i64: 1, 128>}, {transform_indices = @transform_10, window_bounds = array<i64: 8, 128>}, {transform_indices = @transform_11, window_bounds = array<i64: 8, 256>}]} {
    %c0 = arith.constant 0 : index
    %c0_0 = arith.constant 0 : index
    %0 = vector.load %arg1[%c0, %c0_0] : memref<8x128xbf16, #tpu.memory_space<vmem>>, vector<8x128xbf16>
    %c0_1 = arith.constant 0 : index
    %c0_2 = arith.constant 0 : index
    %1 = vector.load %arg3[%c0_1, %c0_2] : memref<128x128xbf16, #tpu.memory_space<vmem>>, vector<128x128xbf16>
    %cst = arith.constant dense<0.000000e+00> : vector<8x128xf32>
    %2 = tpu.matmul %0, %1, %cst {dimension_numbers = #tpu.dot_dimension_numbers<[1], [0], [0], [1], [0, 0, 1, 1], [], []>} : vector<8x128xbf16>, vector<128x128xbf16>, vector<8x128xf32> -> vector<8x128xf32>
    %c0_3 = arith.constant 0 : index
    %c0_4 = arith.constant 0 : index
    %3 = vector.load %arg4[%c0_3, %c0_4] : memref<1x128xf32, #tpu.memory_space<vmem>>, vector<1x128xf32>
    %4 = vector.broadcast %3 : vector<1x128xf32> to vector<8x128xf32>
    %5 = arith.addf %2, %4 : vector<8x128xf32>
    %cst_5 = arith.constant 0.000000e+00 : f32
    %6 = vector.broadcast %cst_5 : f32 to vector<8x128xf32>
    %7 = arith.maximumf %5, %6 : vector<8x128xf32>
    %8 = arith.truncf %7 : vector<8x128xf32> to vector<8x128xbf16>
    %c0_6 = arith.constant 0 : index
    %c0_7 = arith.constant 0 : index
    %9 = vector.load %arg5[%c0_6, %c0_7] : memref<128x256xbf16, #tpu.memory_space<vmem>>, vector<128x256xbf16>
    %cst_8 = arith.constant dense<0.000000e+00> : vector<8x256xf32>
    %10 = tpu.matmul %8, %9, %cst_8 {dimension_numbers = #tpu.dot_dimension_numbers<[1], [0], [0], [1], [0, 0, 1, 1], [], []>} : vector<8x128xbf16>, vector<128x256xbf16>, vector<8x256xf32> -> vector<8x256xf32>
    %c0_9 = arith.constant 0 : index
    %c0_10 = arith.constant 0 : index
    %11 = vector.load %arg6[%c0_9, %c0_10] : memref<1x256xf32, #tpu.memory_space<vmem>>, vector<1x256xf32>
    %12 = vector.broadcast %11 : vector<1x256xf32> to vector<8x256xf32>
    %13 = arith.addf %10, %12 : vector<8x256xf32>
    %14 = vector.extract_strided_slice %13 {offsets = [0, 0], sizes = [8, 128], strides = [1, 1]} : vector<8x256xf32> to vector<8x128xf32>
    %15 = vector.extract_strided_slice %13 {offsets = [0, 128], sizes = [8, 128], strides = [1, 1]} : vector<8x256xf32> to vector<8x128xf32>
    %c0_11 = arith.constant 0 : index
    %c0_12 = arith.constant 0 : index
    %16 = vector.load %arg2[%c0_11, %c0_12] : memref<8x128xf32, #tpu.memory_space<vmem>>, vector<8x128xf32>
    %cst_13 = arith.constant 5.000000e-01 : f32
    %17 = vector.broadcast %cst_13 : f32 to vector<8x128xf32>
    %18 = arith.mulf %17, %15 : vector<8x128xf32>
    %19 = math.exp %18 : vector<8x128xf32>
    %20 = arith.mulf %16, %19 : vector<8x128xf32>
    %21 = arith.addf %14, %20 : vector<8x128xf32>
    %22 = arith.truncf %21 : vector<8x128xf32> to vector<8x128xbf16>
    %c0_14 = arith.constant 0 : index
    %c0_15 = arith.constant 0 : index
    %23 = vector.load %arg7[%c0_14, %c0_15] : memref<128x128xbf16, #tpu.memory_space<vmem>>, vector<128x128xbf16>
    %cst_16 = arith.constant dense<0.000000e+00> : vector<8x128xf32>
    %24 = tpu.matmul %22, %23, %cst_16 {dimension_numbers = #tpu.dot_dimension_numbers<[1], [0], [0], [1], [0, 0, 1, 1], [], []>} : vector<8x128xbf16>, vector<128x128xbf16>, vector<8x128xf32> -> vector<8x128xf32>
    %c0_17 = arith.constant 0 : index
    %c0_18 = arith.constant 0 : index
    %25 = vector.load %arg8[%c0_17, %c0_18] : memref<1x128xf32, #tpu.memory_space<vmem>>, vector<1x128xf32>
    %26 = vector.broadcast %25 : vector<1x128xf32> to vector<8x128xf32>
    %27 = arith.addf %24, %26 : vector<8x128xf32>
    %cst_19 = arith.constant 0.000000e+00 : f32
    %28 = vector.broadcast %cst_19 : f32 to vector<8x128xf32>
    %29 = arith.maximumf %27, %28 : vector<8x128xf32>
    %30 = arith.truncf %29 : vector<8x128xf32> to vector<8x128xbf16>
    %c0_20 = arith.constant 0 : index
    %c0_21 = arith.constant 0 : index
    %31 = vector.load %arg9[%c0_20, %c0_21] : memref<128x128xbf16, #tpu.memory_space<vmem>>, vector<128x128xbf16>
    %cst_22 = arith.constant dense<0.000000e+00> : vector<8x128xf32>
    %32 = tpu.matmul %30, %31, %cst_22 {dimension_numbers = #tpu.dot_dimension_numbers<[1], [0], [0], [1], [0, 0, 1, 1], [], []>} : vector<8x128xbf16>, vector<128x128xbf16>, vector<8x128xf32> -> vector<8x128xf32>
    %c0_23 = arith.constant 0 : index
    %c0_24 = arith.constant 0 : index
    %33 = vector.load %arg10[%c0_23, %c0_24] : memref<1x128xf32, #tpu.memory_space<vmem>>, vector<1x128xf32>
    %34 = vector.broadcast %33 : vector<1x128xf32> to vector<8x128xf32>
    %35 = arith.addf %32, %34 : vector<8x128xf32>
    %36 = arith.negf %35 : vector<8x128xf32>
    %37 = math.exp %36 : vector<8x128xf32>
    %cst_25 = arith.constant 1.000000e+00 : f32
    %38 = vector.broadcast %cst_25 : f32 to vector<8x128xf32>
    %39 = arith.addf %38, %37 : vector<8x128xf32>
    %40 = arith.divf %38, %39 : vector<8x128xf32>
    %c0_26 = arith.constant 0 : index
    %c0_27 = arith.constant 0 : index
    %41 = vector.load %arg11[%c0_26, %c0_27] : memref<8x128xf32, #tpu.memory_space<vmem>>, vector<8x128xf32>
    tpu.vector_store %arg11[%c0_26, %c0_27], %40 {strides = array<i32>} : memref<8x128xf32, #tpu.memory_space<vmem>>, vector<8x128xf32>,
    %c0_28 = arith.constant 0 : index
    %c0_29 = arith.constant 0 : index
    %42 = vector.load %arg12[%c0_28, %c0_29] : memref<8x256xf32, #tpu.memory_space<vmem>>, vector<8x256xf32>
    tpu.vector_store %arg12[%c0_28, %c0_29], %13 {strides = array<i32>} : memref<8x256xf32, #tpu.memory_space<vmem>>, vector<8x256xf32>,
    return
  }
  func.func @transform_0(%arg0: i32) -> (i32, i32) {
    %c0_i32 = arith.constant 0 : i32
    %c0_i32_0 = arith.constant 0 : i32
    return %arg0, %c0_i32 : i32, i32
  }
  func.func @transform_1(%arg0: i32) -> (i32, i32) {
    %c0_i32 = arith.constant 0 : i32
    %c0_i32_0 = arith.constant 0 : i32
    return %arg0, %c0_i32 : i32, i32
  }
  func.func @transform_2(%arg0: i32) -> (i32, i32) {
    %c0_i32 = arith.constant 0 : i32
    %c0_i32_0 = arith.constant 0 : i32
    %c0_i32_1 = arith.constant 0 : i32
    return %c0_i32, %c0_i32_0 : i32, i32
  }
  func.func @transform_3(%arg0: i32) -> (i32, i32) {
    %c0_i32 = arith.constant 0 : i32
    %c0_i32_0 = arith.constant 0 : i32
    %c0_i32_1 = arith.constant 0 : i32
    return %c0_i32, %c0_i32_0 : i32, i32
  }
  func.func @transform_4(%arg0: i32) -> (i32, i32) {
    %c0_i32 = arith.constant 0 : i32
    %c0_i32_0 = arith.constant 0 : i32
    %c0_i32_1 = arith.constant 0 : i32
    return %c0_i32, %c0_i32_0 : i32, i32
  }
  func.func @transform_5(%arg0: i32) -> (i32, i32) {
    %c0_i32 = arith.constant 0 : i32
    %c0_i32_0 = arith.constant 0 : i32
    %c0_i32_1 = arith.constant 0 : i32
    return %c0_i32, %c0_i32_0 : i32, i32
  }
  func.func @transform_6(%arg0: i32) -> (i32, i32) {
    %c0_i32 = arith.constant 0 : i32
    %c0_i32_0 = arith.constant 0 : i32
    %c0_i32_1 = arith.constant 0 : i32
    return %c0_i32, %c0_i32_0 : i32, i32
  }
  func.func @transform_7(%arg0: i32) -> (i32, i32) {
    %c0_i32 = arith.constant 0 : i32
    %c0_i32_0 = arith.constant 0 : i32
    %c0_i32_1 = arith.constant 0 : i32
    return %c0_i32, %c0_i32_0 : i32, i32
  }
  func.func @transform_8(%arg0: i32) -> (i32, i32) {
    %c0_i32 = arith.constant 0 : i32
    %c0_i32_0 = arith.constant 0 : i32
    %c0_i32_1 = arith.constant 0 : i32
    return %c0_i32, %c0_i32_0 : i32, i32
  }
  func.func @transform_9(%arg0: i32) -> (i32, i32) {
    %c0_i32 = arith.constant 0 : i32
    %c0_i32_0 = arith.constant 0 : i32
    %c0_i32_1 = arith.constant 0 : i32
    return %c0_i32, %c0_i32_0 : i32, i32
  }
  func.func @transform_10(%arg0: i32) -> (i32, i32) {
    %c0_i32 = arith.constant 0 : i32
    %c0_i32_0 = arith.constant 0 : i32
    return %arg0, %c0_i32 : i32, i32
  }
  func.func @transform_11(%arg0: i32) -> (i32, i32) {
    %c0_i32 = arith.constant 0 : i32
    %c0_i32_0 = arith.constant 0 : i32
    return %arg0, %c0_i32 : i32, i32
  }
}

</mosaic_0001>

<bundles_post_ra>
// kernel: vae_forward.1
= control target key start
LH: loop header
LB: loop body
LE: loop exit
PB: predicated region body
PF: predicated region fallthrough
CT: control target
= control target key end

     0   :  { %17 = vsyncpa [#allocation3], 0  ;;  %s1046_s0 = inlined_call_operand.vmem [shape: bf16[8,128], index: 0, kind: input, shape index: {}]   ;;  %s1047_s1 = inlined_call_operand.vmem [shape: f32[8,128], index: 1, kind: input, shape index: {}]   ;;  %s1048_s2 = inlined_call_operand.vmem [shape: bf16[128,128], index: 2, kind: input, shape index: {}]   ;;  %s1049_s3 = inlined_call_operand.vmem [shape: f32[1,128], index: 3, kind: input, shape index: {}]   ;;  %s1050_s4 = inlined_call_operand.hbm [shape: bf16[128,256], index: 4, kind: input, shape index: {}]   ;;  %s1051_s5 = inlined_call_operand.vmem [shape: f32[1,256], index: 5, kind: input, shape index: {}]   ;;  %s1052_s6 = inlined_call_operand.hbm [shape: bf16[128,128], index: 6, kind: input, shape index: {}]   ;;  %s1053_s7 = inlined_call_operand.vmem [shape: f32[1,128], index: 7, kind: input, shape index: {}]   ;;  %s1054_s8 = inlined_call_operand.hbm [shape: bf16[128,128], index: 8, kind: input, shape index: {}]   ;;  %s1055_s9 = inlined_call_operand.vmem [shape: f32[1,128], index: 9, kind: input, shape index: {}]   ;;  %s1056_s10 = inlined_call_operand.hbm [shape: f32[8,128], index: 10, kind: output, shape index: {0}]   ;;  %s1057_s11 = inlined_call_operand.vmem [shape: f32[8,256], index: 11, kind: output, shape index: {1}]  }
   0x1   :  { %18 = vsyncpa [#allocation6], 0 }
   0x2   :  { %19 = vsyncpa [#allocation4], 0  ;;  %s885_s17 = smov [#allocation5]  }
   0x3   :  { %s47_s18 = sshll.u32 %s885_s17, 4  ;;  %s48_s18 = int_to_ptr.vmem [resolvable:$true] %s47_s18 }
   0x4   :  { %s807_s19 = scalar_lea.vmem %s48_s18, 1024  ;;  %p812_p1 = scmp.lt.s32.totalorder %s48_s18, %s48_s18 }
   0x5   :  { %p808_p0 = scmp.ne.s32.totalorder %s48_s18, %s807_s19  ;;  %p813_p2 = scmp.lt.s32.totalorder %s807_s19, %s807_s19 }
   0x7   :  { %p814_p3 = por %p813_p2, %p812_p1 }
   0x9   :  { %p815_p4 = pnand %p814_p3, %p808_p0 }
   0xb   :  { %818 = shalt.err (!%p815_p4)
}
   0xc   :  { %s886_s20 = smov 64   ;;  %s887_s21 = smov 4  }
   0xd   :  { %53 = dma.hbm_to_vmem [thread:$0]  %s1052_s6, 1024, %s48_s18, [#allocation6], %s886_s20, %s886_s20, %s887_s21  }
   0xe   :  { %s888_s24 = smov [#allocation2]  }
   0xf   :  { %s33_s25 = sshll.u32 %s888_s24, 4  ;;  %s34_s25 = int_to_ptr.vmem [resolvable:$true] %s33_s25 }
  0x10   :  { %s827_s26 = scalar_lea.vmem %s34_s25, 2048  ;;  %p832_p6 = scmp.lt.s32.totalorder %s34_s25, %s34_s25 }
  0x11   :  { %p828_p5 = scmp.ne.s32.totalorder %s34_s25, %s827_s26  ;;  %p833_p7 = scmp.lt.s32.totalorder %s827_s26, %s827_s26 }
  0x13   :  { %p834_p8 = por %p833_p7, %p832_p6 }
  0x15   :  { %p835_p9 = pnand %p834_p8, %p828_p5 }
  0x17   :  { %838 = shalt.err (!%p835_p9)
}
  0x18   :  { %s889_s27 = smov 128   ;;  %s890_s28 = smov 8  }
  0x19   :  { %39 = dma.hbm_to_vmem [thread:$0]  %s1050_s4, 2048, %s34_s25, [#allocation3], %s889_s27, %s889_s27, %s890_s28  }
  0x1a   :  { %s891_s12 = smov [#allocation7]  }
  0x1b   :  { %s61_s13 = sshll.u32 %s891_s12, 4  ;;  %s62_s13 = int_to_ptr.vmem [resolvable:$true] %s61_s13 }
  0x1c   :  { %s847_s6 = scalar_lea.vmem %s62_s13, 1024  ;;  %p852_p11 = scmp.lt.s32.totalorder %s62_s13, %s62_s13 }
  0x1d   :  { %p848_p10 = scmp.ne.s32.totalorder %s62_s13, %s847_s6  ;;  %p853_p12 = scmp.lt.s32.totalorder %s847_s6, %s847_s6 }
  0x1f   :  { %p854_p13 = por %p853_p12, %p852_p11 }
  0x21   :  { %p855_p0 = pnand %p854_p13, %p848_p10 }
  0x23   :  { %858 = shalt.err (!%p855_p0)
}
  0x24   :  { %67 = dma.hbm_to_vmem [thread:$0]  %s1054_s8, 1024, %s62_s13, [#allocation6], %s886_s20, %s886_s20, %s887_s21  }
  0x25   :  { %879 = dma.done.wait [#allocation3], 2048  }
  0x26   :  { %880 = vsyncadd [#allocation3], 4294965248 }
  0x27   :  { %881 = dma.done.wait [#allocation6], 2048  }
  0x28   :  { %882 = vsyncadd [#allocation6], 4294965248  ;;  %v892_v0 = vmov 0.0   ;;  %vm893_vm0 = vmmov 0   ;;  %v745_v1 = vld [vmem:[%s1048_s2 + $0x38] sm:$0xff]   ;;  %v746_v2 = vld [vmem:[%s1048_s2 + $0x30] sm:$0xff]   ;;  %v212_v49 = vlaneseq }
  0x29   :  { %674 = vmatprep.subr.bf16.mxu0 %v892_v0  ;;  %690 = vmatprep.mubr.msk.bf16.mxu0 %vm893_vm0, %v892_v0  ;;  %v747_v3 = vld [vmem:[%s1048_s2 + $0x28] sm:$0xff]   ;;  %v753_v4 = vld [vmem:[#allocation2 + $0x74] ss:$8 sps:$4 sm:$0xff]   ;;  %v755_v5 = vld [vmem:[#allocation2 + $0x70] ss:$8 sps:$4 sm:$0xff]   ;;  %v894_v26 = vmov 0  }
  0x2a   :  { %675 = vmatpush3.bf16.msra.mxu0 %v745_v1  ;;  %v748_v6 = vld [vmem:[%s1048_s2 + $0x20] sm:$0xff]   ;;  %302 = vmatprep.subr.bf16.mxu1 %v753_v4  ;;  %v759_v9 = vld [vmem:[#allocation2 + $0x54] ss:$8 sps:$4 sm:$0xff]   ;;  %v761_v11 = vld [vmem:[#allocation2 + $0x50] ss:$8 sps:$4 sm:$0xff]   ;;  %v213_v50 = vshrl.u32 %v212_v49, 7 }
  0x2b   :  { %676 = vmatprep.subr.bf16.mxu0 %v892_v0  ;;  %v756_v7 = vld [vmem:[#allocation2 + $0x64] ss:$8 sps:$4 sm:$0xff]   ;;  %303 = vmatpush1.bf16.msra.mxu1 %v755_v5  ;;  %v758_v8 = vld [vmem:[#allocation2 + $0x60] ss:$8 sps:$4 sm:$0xff]   ;;  %v749_v10 = vld [vmem:[%s1048_s2 + $0x18] sm:$0xff]  }
  0x2c   :  { %304 = vmatprep.subr.bf16.mxu1 %v756_v7  ;;  %v750_v12 = vld [vmem:[%s1048_s2 + $0x10] sm:$0xff]   ;;  %v762_v13 = vld [vmem:[#allocation2 + $0x44] ss:$8 sps:$4 sm:$0xff]   ;;  %v764_v14 = vld [vmem:[#allocation2 + $0x40] ss:$8 sps:$4 sm:$0xff]   ;;  %334 = vmatprep.mubr.bf16.mxu1 %v894_v26  ;;  %v214_v51 = vsub.s32 0, %v213_v50 }
  0x2d   :  { %v765_v15 = vld [vmem:[#allocation2 + $0x34] ss:$8 sps:$4 sm:$0xff]   ;;  %v751_v16 = vld [vmem:[%s1048_s2 + $0x8] sm:$0xff]   ;;  %v767_v17 = vld [vmem:[#allocation2 + $0x30] ss:$8 sps:$4 sm:$0xff]   ;;  %v218_v53 = vsub.s32 1, %v213_v50 }
  0x2e   :  { %677 = vmatpush3.bf16.msra.mxu0 %v746_v2  ;;  %v768_v18 = vld [vmem:[#allocation2 + $0x24] ss:$8 sps:$4 sm:$0xff]   ;;  %v770_v20 = vld [vmem:[#allocation2 + $0x20] ss:$8 sps:$4 sm:$0xff]   ;;  %v771_v21 = vld [vmem:[#allocation2 + $0x14] ss:$8 sps:$4 sm:$0xff]  }
  0x2f   :  { %678 = vmatprep.subr.bf16.mxu0 %v892_v0  ;;  %305 = vmatpush1.bf16.msra.mxu1 %v758_v8  ;;  %v752_v19 = vld [vmem:[%s1048_s2] sm:$0xff]   ;;  %v773_v23 = vld [vmem:[#allocation2 + $0x10] ss:$8 sps:$4 sm:$0xff]   ;;  %v779_v37 = vld [vmem:[#allocation5 + $0x28] sm:$0xff]  }
  0x30   :  { %306 = vmatprep.subr.bf16.mxu1 %v759_v9  ;;  %v80_v22 = vld [vmem:[%s1046_s0] sm:$0xf]  ;;  %v774_v24 = vld [vmem:[#allocation2 + $0x4] ss:$8 sps:$4 sm:$0xff]   ;;  %v777_v27 = vld [vmem:[#allocation5 + $0x38] sm:$0xff]  }
  0x31   :  { %v776_v25 = vld [vmem:[#allocation2] ss:$8 sps:$4 sm:$0xff]   ;;  %v778_v36 = vld [vmem:[#allocation5 + $0x30] sm:$0xff]   ;;  %v781_v39 = vld [vmem:[#allocation5 + $0x18] sm:$0xff]  }
  0x32   :  { %679 = vmatpush3.bf16.msra.mxu0 %v747_v3  ;;  %v603_v28 = vld [vmem:[%s1049_s3] ss:$0 sm:$0xff]  ;;  %v782_v40 = vld [vmem:[#allocation5 + $0x10] sm:$0xff]   ;;  %v783_v41 = vld [vmem:[#allocation5 + $0x8] sm:$0xff]  }
  0x33   :  { %680 = vmatprep.subr.bf16.mxu0 %v892_v0  ;;  %307 = vmatpush1.bf16.msra.mxu1 %v761_v11  ;;  %v780_v38 = vld [vmem:[#allocation5 + $0x20] sm:$0xff]   ;;  %v785_v43 = vld [vmem:[#allocation7 + $0x38] sm:$0xff]   ;;  %v786_v44 = vld [vmem:[#allocation7 + $0x30] sm:$0xff]  }
  0x34   :  { %308 = vmatprep.subr.bf16.mxu1 %v762_v13  ;;  %v784_v42 = vld [vmem:[#allocation5] sm:$0xff]   ;;  %v787_v45 = vld [vmem:[#allocation7 + $0x28] sm:$0xff]   ;;  %v789_v47 = vld [vmem:[#allocation7 + $0x18] sm:$0xff]  }
  0x35   :  { %v788_v46 = vld [vmem:[#allocation7 + $0x20] sm:$0xff]   ;;  %v790_v48 = vld [vmem:[#allocation7 + $0x10] sm:$0xff]  }
  0x36   :  { %681 = vmatpush3.bf16.msra.mxu0 %v748_v6  ;;  %v210_v52 = vld [vmem:[%s1051_s5] sm:$0x3]  ;;  %v791_v6 = vld [vmem:[#allocation7 + $0x8] sm:$0xff]  }
  0x37   :  { %682 = vmatprep.subr.bf16.mxu0 %v892_v0  ;;  %309 = vmatpush1.bf16.msra.mxu1 %v764_v14  ;;  %v215_v54 = vrot.slane %v210_v52, %v214_v51  ;;  %v219_v55 = vrot.slane %v210_v52, %v218_v53  ;;  %v343_v1 = vld [vmem:[%s1047_s1] sm:$0xff] }
  0x38   :  { %310 = vmatprep.subr.bf16.mxu1 %v765_v15  ;;  %v792_v7 = vld [vmem:[#allocation7] sm:$0xff]  }
  0x39   :  { %v628_v8 = vld [vmem:[%s1053_s7] ss:$0 sm:$0xff]  ;;  %s895_s7 = smov [#allocation8]  }
  0x3a   :  { %683 = vmatpush3.bf16.msra.mxu0 %v749_v10  ;;  %s589_s8 = sshll.u32 %s895_s7, 4  ;;  %s590_s8 = int_to_ptr.vmem [resolvable:$true] %s589_s8 }
  0x3b   :  { %684 = vmatprep.subr.bf16.mxu0 %v892_v0  ;;  %311 = vmatpush1.bf16.msra.mxu1 %v767_v17  ;;  %s859_s19 = scalar_lea.vmem %s590_s8, 128  ;;  %p864_p2 = scmp.lt.s32.totalorder %s590_s8, %s590_s8 }
  0x3c   :  { %312 = vmatprep.subr.bf16.mxu1 %v768_v18  ;;  %p860_p1 = scmp.ne.s32.totalorder %s590_s8, %s859_s19  ;;  %p865_p3 = scmp.lt.s32.totalorder %s859_s19, %s859_s19 }
  0x3e   :  { %685 = vmatpush3.bf16.msra.mxu0 %v750_v12  ;;  %p866_p4 = por %p865_p3, %p864_p2 }
  0x3f   :  { %686 = vmatprep.subr.bf16.mxu0 %v892_v0  ;;  %313 = vmatpush1.bf16.msra.mxu1 %v770_v20 }
  0x40   :  { %314 = vmatprep.subr.bf16.mxu1 %v771_v21  ;;  %p867_p5 = pnand %p866_p4, %p860_p1 }
  0x42   :  { %687 = vmatpush3.bf16.msra.mxu0 %v751_v16  ;;  %v637_v16 = vld [vmem:[%s1055_s9] ss:$0 sm:$0xff] }
  0x43   :  { %688 = vmatprep.subr.bf16.mxu0 %v892_v0  ;;  %315 = vmatpush1.bf16.msra.mxu1 %v773_v23 }
  0x44   :  { %316 = vmatprep.subr.bf16.mxu1 %v774_v24 }
  0x46   :  { %689 = vmatpush3.bf16.msra.mxu0 %v752_v19 }
  0x47   :  { %694 = vmatprep.subr.bf16.mxu0 %v892_v0  ;;  %317 = vmatpush1.bf16.msra.mxu1 %v776_v25 }
  0x48   :  { %714 = vmatprep.subr.bf16.mxu1 %v892_v0 }
  0x49   :  { %691 = vmatmul.mubr.bf16.vlgmr.msra.gmra.mxu0 %v80_v22 }
  0x4a   :  { %710 = vmatprep.mubr.msk.bf16.mxu0 %vm893_vm0, %v892_v0  ;;  %695 = vmatpush3.bf16.msra.mxu0 %v777_v27 }
  0x4b   :  { %696 = vmatprep.subr.bf16.mxu0 %v892_v0 }
  0x4e   :  { %697 = vmatpush3.bf16.msra.mxu0 %v778_v36 }
  0x4f   :  { %698 = vmatprep.subr.bf16.mxu0 %v892_v0 }
  0x52   :  { %699 = vmatpush3.bf16.msra.mxu0 %v779_v37 }
  0x53   :  { %700 = vmatprep.subr.bf16.mxu0 %v892_v0 }
  0x56   :  { %701 = vmatpush3.bf16.msra.mxu0 %v780_v38 }
  0x57   :  { %702 = vmatprep.subr.bf16.mxu0 %v892_v0 }
  0x5a   :  { %703 = vmatpush3.bf16.msra.mxu0 %v781_v39 }
  0x5b   :  { %704 = vmatprep.subr.bf16.mxu0 %v892_v0 }
  0x5e   :  { %705 = vmatpush3.bf16.msra.mxu0 %v782_v40 }
  0x5f   :  { %706 = vmatprep.subr.bf16.mxu0 %v892_v0 }
  0x62   :  { %707 = vmatpush3.bf16.msra.mxu0 %v783_v41 }
  0x63   :  { %708 = vmatprep.subr.bf16.mxu0 %v892_v0 }
  0x66   :  { %709 = vmatpush3.bf16.msra.mxu0 %v784_v42 }
 0x109   :  { %v186_v29 = vpop.f32.mrf.mxu0 }
 0x10a   :  { %v187_v30 = vadd.f32 %v603_v28, %v186_v29 }
 0x10b   :  { %v692_v31 = vpop.f32.mrf.mxu0 }
 0x10c   :  { %v192_v32 = vmax.f32 %v187_v30, 0.0 }
 0x10d   :  { %v189_v33 = vpop.f32.mrf.mxu0 }
 0x10e   :  { %v193_v34 = vpack.c.bf16 %v192_v32, %v192_v32 }
 0x10f   :  { %v693_v35 = vpop.f32.mrf.mxu0 }
 0x110   :  { %335 = vmatmul.mubr.bf16.vlgmr.msra.gmra.mxu1 %v193_v34 }
 0x111   :  { %730 = vmatprep.mubr.msk.bf16.mxu1 %vm893_vm0, %v892_v0  ;;  %715 = vmatpush3.bf16.msra.mxu1 %v785_v43 }
 0x112   :  { %716 = vmatprep.subr.bf16.mxu1 %v892_v0 }
 0x115   :  { %717 = vmatpush3.bf16.msra.mxu1 %v786_v44 }
 0x116   :  { %718 = vmatprep.subr.bf16.mxu1 %v892_v0 }
 0x119   :  { %719 = vmatpush3.bf16.msra.mxu1 %v787_v45 }
 0x11a   :  { %720 = vmatprep.subr.bf16.mxu1 %v892_v0 }
 0x11d   :  { %721 = vmatpush3.bf16.msra.mxu1 %v788_v46 }
 0x11e   :  { %722 = vmatprep.subr.bf16.mxu1 %v892_v0 }
 0x121   :  { %723 = vmatpush3.bf16.msra.mxu1 %v789_v47 }
 0x122   :  { %724 = vmatprep.subr.bf16.mxu1 %v892_v0 }
 0x125   :  { %725 = vmatpush3.bf16.msra.mxu1 %v790_v48 }
 0x126   :  { %726 = vmatprep.subr.bf16.mxu1 %v892_v0 }
 0x129   :  { %727 = vmatpush3.bf16.msra.mxu1 %v791_v6 }
 0x12a   :  { %728 = vmatprep.subr.bf16.mxu1 %v892_v0 }
 0x12d   :  { %729 = vmatpush3.bf16.msra.mxu1 %v792_v7 }
 0x1d0   :  { %v336_v56 = vpop.f32.mrf.mxu1 }
 0x1d1   :  { %v337_v57 = vadd.f32 %v336_v56, %v215_v54 }
 0x1d2   :  { %v338_v58 = vpop.f32.mrf.mxu1 }
 0x1d3   :  { %581 = vst [vmem:[%s1057_s11] sm:$0xff] %v337_v57  ;;  %v339_v59 = vadd.f32 %v338_v58, %v219_v55 }
 0x1d4   :  { %v340_v60 = vpop.f32.mrf.mxu1 }
 0x1d5   :  { %v344_v61 = vmul.f32 0.5, %v339_v59  ;;  %582 = vst [vmem:[%s1057_s11 + $0x8] sm:$0xff] %v339_v59 }
 0x1d6   :  { %v341_v62 = vpop.f32.mrf.mxu1 }
 0x1d7   :  { %v345_v63 = vmul.f32 1.442695, %v344_v61 }
 0x1d9   :  { %793 = vpow2.f32 %v345_v63 }
 0x1e6   :  { %v794_v2 = vpop.eup %793 }
 0x1e7   :  { %v347_v3 = vmul.f32 %v794_v2, %v343_v1 }
 0x1e9   :  { %v348_v4 = vadd.f32 %v347_v3, %v337_v57 }
 0x1eb   :  { %v349_v5 = vpack.c.bf16 %v348_v4, %v348_v4 }
 0x1ed   :  { %711 = vmatmul.mubr.bf16.vlgmr.msra.gmra.mxu0 %v349_v5 }
 0x2ad   :  { %v455_v9 = vpop.f32.mrf.mxu0 }
 0x2ae   :  { %v456_v10 = vadd.f32 %v628_v8, %v455_v9 }
 0x2af   :  { %v712_v11 = vpop.f32.mrf.mxu0 }
 0x2b0   :  { %v461_v12 = vmax.f32 %v456_v10, 0.0 }
 0x2b1   :  { %v458_v13 = vpop.f32.mrf.mxu0 }
 0x2b2   :  { %v462_v14 = vpack.c.bf16 %v461_v12, %v461_v12 }
 0x2b3   :  { %v713_v15 = vpop.f32.mrf.mxu0 }
 0x2b4   :  { %731 = vmatmul.mubr.bf16.vlgmr.msra.gmra.mxu1 %v462_v14 }
 0x374   :  { %v568_v17 = vpop.f32.mrf.mxu1 }
 0x375   :  { %v569_v0 = vadd.f32 %v637_v16, %v568_v17 }
 0x376   :  { %v732_v18 = vpop.f32.mrf.mxu1 }
 0x377   :  { %v646_v19 = vmul.f32 -1.442695, %v569_v0 }
 0x378   :  { %v571_v20 = vpop.f32.mrf.mxu1 }
 0x379   :  { %795 = vpow2.f32 %v646_v19 }
 0x37a   :  { %v733_v21 = vpop.f32.mrf.mxu1 }
 0x386   :  { %v796_v22 = vpop.eup %795 }
 0x387   :  { %v577_v23 = vadd.f32 1.0, %v796_v22 }
 0x389   :  { %797 = vrcp.f32 %v577_v23 }
 0x396   :  { %v798_v24 = vpop.eup %797 }
 0x397   :  { %580 = vst [vmem:[#allocation8] sm:$0xff] %v798_v24 }
 0x398   :  { %870 = shalt.err (!%p867_p5)
}
 0x399   :  { %592 = dma.vmem_to_hbm [thread:$0]  %s590_s8, 128, %s1056_s10, [#allocation4]  }
 0x39a   :  { %883 = dma.done.wait [#allocation4], 128  }
 0x39b   :  { %884 = vsyncadd [#allocation4], 4294967168 }
 0x39c   :  { %600 = vsyncpa [#allocation3], 1 }
 0x39d   :  { %601 = vsyncpa [#allocation6], 1 }
 0x39e   :  { %602 = vsyncpa [#allocation4], 1 }

</bundles_post_ra>
